<compile_context>
chip_gen: v5e
topology: v5e:2x2
jax: 0.10.0
libtpu: 0.0.40
codegen_flags: <defaults>
</compile_context>

<pallas_src>
import functools
import math

import jax
import jax.numpy as jnp
from jax.experimental import pallas as pl
from jax.experimental.pallas import tpu as pltpu


def _round_up(x, m):
    return ((x + m - 1) // m) * m


def _cdiv(a, b):
    return (a + b - 1) // b


# ----------------------------------------------------------------------------
# Pallas kernel
# ----------------------------------------------------------------------------
def _lookahead_kernel(x_ref, h_ref, w_ref, o_ref, *, tile_t, halo_t, context,
                      seq_len):
    # x_ref: (tile_t, tf)      current time tile (input dtype)
    # h_ref: (halo_t, tf)      halo = next halo_t rows (may hold stale data
    #                          past seq_len; masked below)
    # w_ref: (context+1, tf)   per-feature lookahead taps (f32)
    # o_ref: (tile_t, tf)
    i = pl.program_id(1)                       # time-tile index (inner axis)

    xc = x_ref[...].astype(jnp.float32)
    xh = h_ref[...].astype(jnp.float32)

    # Zero rows past the true sequence length.  The masked halo doubles as the
    # module's causal zero padding; it is also what makes partial edge blocks
    # (clamped DMAs with garbage tails) correct.
    if seq_len % tile_t != 0:                  # static gate: only partial main tiles
        r = jax.lax.broadcasted_iota(jnp.int32, (tile_t, 1), 0)
        xc = jnp.where(i * tile_t + r < seq_len, xc, 0.0)
    rh = jax.lax.broadcasted_iota(jnp.int32, (halo_t, 1), 0)
    xh = jnp.where((i + 1) * tile_t + rh < seq_len, xh, 0.0)

    win = jnp.concatenate([xc, xh], axis=0)    # (tile_t + halo_t, tf)
    w = w_ref[...]                             # (context+1, tf), f32

    acc = win[0:tile_t, :] * w[0:1, :]
    for c in range(1, context + 1):            # small static unroll (VPU MACs)
        acc = acc + win[c:c + tile_t, :] * w[c:c + 1, :]

    o_ref[...] = acc.astype(o_ref.dtype)


# ----------------------------------------------------------------------------
# Wrapper
# ----------------------------------------------------------------------------
def lookahead_forward(x_tnh, weight, context, *, tile_t=None, tile_f=None):
    """Lookahead forward pass.

    x_tnh:  (T, N, H)  -- PyTorch layout (seq_len, batch, n_features)
    weight: (H, context + 1)
    returns (T, N, H), same dtype as x_tnh
    """
    assert x_tnh.ndim == 3
    T, N, H = x_tnh.shape
    C1 = context + 1
    assert weight.shape == (H, C1), weight.shape
    assert context > 0

    F = N * H
    x_dtype = x_tnh.dtype
    sub = 16 if x_dtype == jnp.bfloat16 else 8           # sublane multiple

    halo_t = _round_up(context, sub)                      # halo rows (>= context)
    if tile_t is None:
        tile_t = min(512, _round_up(T, sub))
    tile_t = _round_up(max(int(tile_t), sub), halo_t)     # multiple of halo_t
    num_t = _cdiv(T, tile_t)

    if tile_f is None:
        tile_f = F if F <= 2048 else 2048                 # full dim or lane-aligned
    num_f = _cdiv(F, tile_f)
    # NOTE: if F = N*H is not a multiple of 128 the final stores are masked;
    # demo uses F=256 so stores stay lane-dense.

    # Zero-copy layout: (T, N, H) -> (T, N*H) is a contiguous reshape (free).
    x2d = x_tnh.reshape(T, F)
    # Per-tap weights broadcast over batch: w_b[c, n*H + h] = weight[h, c].
    w_b = jnp.tile(jnp.transpose(weight.astype(jnp.float32)), (1, N))  # (C1, F)

    stride = tile_t // halo_t                 # halo blocks per time tile
    max_hb = _cdiv(T, halo_t) - 1             # last valid halo block index

    kernel = functools.partial(_lookahead_kernel, tile_t=tile_t, halo_t=halo_t,
                               context=context, seq_len=T)

    itemsize = jnp.dtype(x_dtype).itemsize
    cost = pl.CostEstimate(
        flops=2 * C1 * T * F,
        transcendentals=0,
        bytes_accessed=(2 * T * F + num_t * halo_t * F) * itemsize + C1 * F * 4,
    )

    out2d = pl.pallas_call(
        kernel,
        out_shape=jax.ShapeDtypeStruct((T, F), x_dtype),
        grid=(num_f, num_t),
        in_specs=[
            # main time tile i of feature block j
            pl.BlockSpec((tile_t, tile_f), lambda j, i: (i, j)),
            # halo: first halo_t rows after the tile (block index clamped; any
            # rows with intended global index >= T are masked in-kernel)
            pl.BlockSpec((halo_t, tile_f),
                         lambda j, i: (jnp.minimum((i + 1) * stride, max_hb), j)),
            # taps (constant across the inner time axis -> fetched once per j)
            pl.BlockSpec((C1, tile_f), lambda j, i: (0, j)),
        ],
        out_specs=pl.BlockSpec((tile_t, tile_f), lambda j, i: (i, j)),
        compiler_params=pltpu.CompilerParams(
            dimension_semantics=("parallel", "parallel"),
            vmem_limit_bytes=48 * 1024 * 1024,
        ),
        cost_estimate=cost,
    )(x2d, x2d, w_b)

    return out2d.reshape(T, N, H)


# ----------------------------------------------------------------------------
# Pure-JAX reference (mirrors the PyTorch forward exactly)
# ----------------------------------------------------------------------------
def lookahead_reference(x_tnh, weight, context):
    T = x_tnh.shape[0]
    pad = jnp.zeros((context,) + x_tnh.shape[1:], x_tnh.dtype)
    x_pad = jnp.concatenate([x_tnh, pad], axis=0)                     # (T+ctx, N, H)
    win = jnp.stack([x_pad[i:i + context + 1] for i in range(T)], 0)  # (T, C1, N, H)
    win = jnp.transpose(win, (0, 2, 3, 1))                            # (T, N, H, C1)
    return jnp.sum(win * weight, axis=3)                              # (T, N, H)


# ----------------------------------------------------------------------------
if __name__ == "__main__":
    key = jax.random.PRNGKey(0)
    k_w, k_x = jax.random.split(key)

    # Small shapes consistent with the module: (seq_len, batch, n_features).
    T, N, H, context = 16, 2, 128, 4

    stdv = 1.0 / math.sqrt(context + 1)
    weight = jax.random.uniform(k_w, (H, context + 1), jnp.float32, -stdv, stdv)
    x = jax.random.normal(k_x, (T, N, H), jnp.float32)

    out = lookahead_forward(x, weight, context)
    out = jax.block_until_ready(out)
    assert out.shape == (T, N, H), out.shape
    assert out.dtype == x.dtype, out.dtype
    assert bool(jnp.all(jnp.isfinite(out)))

    ref = lookahead_reference(x, weight, context)
    assert bool(jnp.allclose(out, ref, atol=1e-5, rtol=1e-5)), \
        float(jnp.max(jnp.abs(out - ref)))

    print("KERNEL_OK")
</pallas_src>

<mosaic_0001>
module attributes {stable_mosaic.version = 11 : i64} {
  func.func @_lookahead_kernel(%arg0: i32, %arg1: i32, %arg2: memref<16x256xf32, #tpu.memory_space<vmem>>, %arg3: memref<8x256xf32, #tpu.memory_space<vmem>>, %arg4: memref<5x256xf32, #tpu.memory_space<vmem>>, %arg5: memref<16x256xf32, #tpu.memory_space<vmem>>) attributes {dimension_semantics = [#tpu.dimension_semantics<parallel>, #tpu.dimension_semantics<parallel>], iteration_bounds = array<i64: 1, 1>, scalar_prefetch = 0 : i64, scratch_operands = 0 : i64, tpu.core_type = #tpu.core_type<tc>, window_params = [{transform_indices = @transform_0, window_bounds = array<i64: 16, 256>}, {transform_indices = @transform_1, window_bounds = array<i64: 8, 256>}, {transform_indices = @transform_2, window_bounds = array<i64: 5, 256>}, {transform_indices = @transform_3, window_bounds = array<i64: 16, 256>}]} {
    %c0 = arith.constant 0 : index
    %c0_0 = arith.constant 0 : index
    %0 = vector.load %arg2[%c0, %c0_0] : memref<16x256xf32, #tpu.memory_space<vmem>>, vector<16x256xf32>
    %c0_1 = arith.constant 0 : index
    %c0_2 = arith.constant 0 : index
    %1 = vector.load %arg3[%c0_1, %c0_2] : memref<8x256xf32, #tpu.memory_space<vmem>>, vector<8x256xf32>
    %2 = tpu.iota {dimensions = array<i32: 0>} : vector<8x1xi32>
    %c1_i32 = arith.constant 1 : i32
    %3 = arith.addi %arg1, %c1_i32 : i32
    %c16_i32 = arith.constant 16 : i32
    %4 = arith.muli %3, %c16_i32 : i32
    %5 = vector.broadcast %4 : i32 to vector<8x1xi32>
    %6 = arith.addi %5, %2 : vector<8x1xi32>
    %c16_i32_3 = arith.constant 16 : i32
    %7 = vector.broadcast %c16_i32_3 : i32 to vector<8x1xi32>
    %8 = arith.cmpi slt, %6, %7 : vector<8x1xi32>
    %cst = arith.constant 0.000000e+00 : f32
    %9 = vector.shape_cast %8 : vector<8x1xi1> to vector<8x1xi1>
    %10 = vector.broadcast %9 : vector<8x1xi1> to vector<8x256xi1>
    %11 = vector.broadcast %cst : f32 to vector<8x256xf32>
    %12 = arith.select %10, %1, %11 : vector<8x256xi1>, vector<8x256xf32>
    %13 = tpu.concatenate %0, %12 in 0 : vector<16x256xf32>, vector<8x256xf32> -> vector<24x256xf32>
    %c0_4 = arith.constant 0 : index
    %c0_5 = arith.constant 0 : index
    %14 = vector.load %arg4[%c0_4, %c0_5] : memref<5x256xf32, #tpu.memory_space<vmem>>, vector<5x256xf32>
    %15 = vector.extract_strided_slice %13 {offsets = [0, 0], sizes = [16, 256], strides = [1, 1]} : vector<24x256xf32> to vector<16x256xf32>
    %16 = vector.extract_strided_slice %14 {offsets = [0, 0], sizes = [1, 256], strides = [1, 1]} : vector<5x256xf32> to vector<1x256xf32>
    %17 = vector.broadcast %16 : vector<1x256xf32> to vector<16x256xf32>
    %18 = arith.mulf %15, %17 : vector<16x256xf32>
    %19 = vector.extract_strided_slice %13 {offsets = [1, 0], sizes = [16, 256], strides = [1, 1]} : vector<24x256xf32> to vector<16x256xf32>
    %20 = vector.extract_strided_slice %14 {offsets = [1, 0], sizes = [1, 256], strides = [1, 1]} : vector<5x256xf32> to vector<1x256xf32>
    %21 = vector.broadcast %20 : vector<1x256xf32> to vector<16x256xf32>
    %22 = arith.mulf %19, %21 : vector<16x256xf32>
    %23 = arith.addf %18, %22 : vector<16x256xf32>
    %24 = vector.extract_strided_slice %13 {offsets = [2, 0], sizes = [16, 256], strides = [1, 1]} : vector<24x256xf32> to vector<16x256xf32>
    %25 = vector.extract_strided_slice %14 {offsets = [2, 0], sizes = [1, 256], strides = [1, 1]} : vector<5x256xf32> to vector<1x256xf32>
    %26 = vector.broadcast %25 : vector<1x256xf32> to vector<16x256xf32>
    %27 = arith.mulf %24, %26 : vector<16x256xf32>
    %28 = arith.addf %23, %27 : vector<16x256xf32>
    %29 = vector.extract_strided_slice %13 {offsets = [3, 0], sizes = [16, 256], strides = [1, 1]} : vector<24x256xf32> to vector<16x256xf32>
    %30 = vector.extract_strided_slice %14 {offsets = [3, 0], sizes = [1, 256], strides = [1, 1]} : vector<5x256xf32> to vector<1x256xf32>
    %31 = vector.broadcast %30 : vector<1x256xf32> to vector<16x256xf32>
    %32 = arith.mulf %29, %31 : vector<16x256xf32>
    %33 = arith.addf %28, %32 : vector<16x256xf32>
    %34 = vector.extract_strided_slice %13 {offsets = [4, 0], sizes = [16, 256], strides = [1, 1]} : vector<24x256xf32> to vector<16x256xf32>
    %35 = vector.extract_strided_slice %14 {offsets = [4, 0], sizes = [1, 256], strides = [1, 1]} : vector<5x256xf32> to vector<1x256xf32>
    %36 = vector.broadcast %35 : vector<1x256xf32> to vector<16x256xf32>
    %37 = arith.mulf %34, %36 : vector<16x256xf32>
    %38 = arith.addf %33, %37 : vector<16x256xf32>
    %c0_6 = arith.constant 0 : index
    %c0_7 = arith.constant 0 : index
    %39 = vector.load %arg5[%c0_6, %c0_7] : memref<16x256xf32, #tpu.memory_space<vmem>>, vector<16x256xf32>
    tpu.vector_store %arg5[%c0_6, %c0_7], %38 {strides = array<i32>} : memref<16x256xf32, #tpu.memory_space<vmem>>, vector<16x256xf32>,
    return
  }
  func.func @transform_0(%arg0: i32, %arg1: i32) -> (i32, i32) {
    %c0_i32 = arith.constant 0 : i32
    return %arg1, %arg0 : i32, i32
  }
  func.func @transform_1(%arg0: i32, %arg1: i32) -> (i32, i32) {
    %c1_i32 = arith.constant 1 : i32
    %0 = arith.addi %arg1, %c1_i32 : i32
    %c2_i32 = arith.constant 2 : i32
    %1 = arith.muli %0, %c2_i32 : i32
    %c1_i32_0 = arith.constant 1 : i32
    %2 = arith.minsi %1, %c1_i32_0 : i32
    %c0_i32 = arith.constant 0 : i32
    return %2, %arg0 : i32, i32
  }
  func.func @transform_2(%arg0: i32, %arg1: i32) -> (i32, i32) {
    %c0_i32 = arith.constant 0 : i32
    %c0_i32_0 = arith.constant 0 : i32
    return %c0_i32, %arg0 : i32, i32
  }
  func.func @transform_3(%arg0: i32, %arg1: i32) -> (i32, i32) {
    %c0_i32 = arith.constant 0 : i32
    return %arg1, %arg0 : i32, i32
  }
}

</mosaic_0001>

<bundles_post_ra>
// kernel: tpu_custom_call.1
= control target key start
LH: loop header
LB: loop body
LE: loop exit
PB: predicated region body
PF: predicated region fallthrough
CT: control target
= control target key end

     0   :  { %8 = vsyncpa [#allocation3], 0  ;;  %s448_s0 = inlined_call_operand.hbm [shape: f32[16,256], index: 0, kind: input, shape index: {}]   ;;  %s449_s1 = inlined_call_operand.hbm [shape: f32[16,256], index: 1, kind: input, shape index: {}]   ;;  %s450_s2 = inlined_call_operand.hbm [shape: f32[5,256], index: 2, kind: input, shape index: {}]   ;;  %s451_s3 = inlined_call_operand.hbm [shape: f32[16,256], index: 3, kind: output, shape index: {}]  }
   0x1   :  { %9 = vsyncpa [#allocation6], 0  ;;  %s34_s14 = scalar_lea.hbm %s449_s1, 16 }
   0x2   :  { %10 = vsyncpa [#allocation4], 0  ;;  %s36_s15 = sshll.u32 %s34_s14, 4  ;;  %s360_s16 = smov [#allocation5]   ;;  %s37_s15 = int_to_ptr.hbm [resolvable:$true] %s36_s15 }
   0x3   :  { %s38_s17 = sshll.u32 %s360_s16, 4  ;;  %s15_s20 = sshll.u32 %s448_s0, 4  ;;  %s39_s17 = int_to_ptr.vmem [resolvable:$true] %s38_s17  ;;  %s16_s20 = int_to_ptr.hbm [resolvable:$true] %s15_s20 }
   0x4   :  { %41 = dma.hbm_to_vmem [thread:$0]  %s37_s15, 256, %s39_s17, [#allocation6]  }
   0x5   :  { %s361_s21 = smov [#allocation2]   ;;  %s47_s25 = sshll.u32 %s450_s2, 4  ;;  %s48_s25 = int_to_ptr.hbm [resolvable:$true] %s47_s25 }
   0x6   :  { %s17_s22 = sshll.u32 %s361_s21, 4  ;;  %s362_s1 = smov 256   ;;  %s18_s22 = int_to_ptr.vmem [resolvable:$true] %s17_s22 }
   0x7   :  { %s363_s26 = smov 16   ;;  %s364_s27 = smov [#allocation7]  }
   0x8   :  { %23 = dma.hbm_to_vmem [thread:$0]  %s16_s20, 512, %s18_s22, [#allocation3], %s362_s1, %s362_s1, %s363_s26  }
   0x9   :  { %s49_s28 = sshll.u32 %s364_s27, 4  ;;  %s50_s28 = int_to_ptr.vmem [resolvable:$true] %s49_s28 }
   0xa   :  { %52 = dma.hbm_to_vmem [thread:$0]  %s48_s25, 256, %s50_s28, [#allocation6]  }
   0xb   :  { %354 = dma.done.wait [#allocation3], 512  }
   0xc   :  { %355 = vsyncadd [#allocation3], 4294966784 }
   0xd   :  { %356 = dma.done.wait [#allocation6], 512  }
   0xe   :  { %357 = vsyncadd [#allocation6], 4294966784  ;;  %v69_v0 = vld [vmem:[#allocation2] sm:$0xff]  ;;  %v71_v1 = vld [vmem:[#allocation2 + $0x10] sm:$0xff]  ;;  %vm108_vm0 = vcmask 1046528   ;;  %vm141_vm1 = vcmask 1045504  }
   0xf   :  { %v86_v2 = vld [vmem:[#allocation7] sm:$0x1f]  ;;  %vm174_vm2 = vcmask 1044480   ;;  %vm207_vm3 = vcmask 1043456   ;;  %v408_v16 = vld [vmem:[#allocation7 + $0x8] sm:$0x1f] }
  0x10   :  { %v88_v3 = vperm.slane %v86_v2, 0  ;;  %v94_v4 = vperm.slane %v86_v2, 1  ;;  %v398_v5 = vperm.slane %v86_v2, 2  ;;  %v160_v6 = vperm.slane %v86_v2, 3  ;;  %v70_v25 = vld [vmem:[#allocation2 + $0x8] sm:$0xff]  ;;  %v72_v26 = vld [vmem:[#allocation2 + $0x18] sm:$0xff] }
  0x11   :  { %v193_v7 = vperm.slane %v86_v2, 4  ;;  %v89_v29 = vperm.slane %v408_v16, 0  ;;  %v95_v30 = vperm.slane %v408_v16, 1  ;;  %v128_v34 = vperm.slane %v408_v16, 2  ;;  %s365_s0 = smov [#allocation8]   ;;  %s236_s4 = sshll.u32 %s451_s3, 4  ;;  %s237_s4 = int_to_ptr.hbm [resolvable:$true] %s236_s4 }
  0x12   :  { %v90_v8 = vmul.f32 %v88_v3, %v69_v0  ;;  %v96_v9 = vmul.f32 %v94_v4, %v69_v0  ;;  %v400_v10 = vmul.f32 %v94_v4, %v71_v1  ;;  %v129_v11 = vmul.f32 %v398_v5, %v69_v0  ;;  %s234_s2 = sshll.u32 %s365_s0, 4  ;;  %s235_s2 = int_to_ptr.vmem [resolvable:$true] %s234_s2 }
  0x13   :  { %v404_v12 = vmul.f32 %v398_v5, %v71_v1  ;;  %v162_v13 = vmul.f32 %v160_v6, %v69_v0  ;;  %v406_v14 = vmul.f32 %v160_v6, %v71_v1  ;;  %v195_v15 = vmul.f32 %v193_v7, %v69_v0 }
  0x14   :  { %v109_v17 = vrot.slane %v96_v9, 1  ;;  %v110_v18 = vrot.slane %v400_v10, 1  ;;  %v142_v19 = vrot.slane %v129_v11, 2  ;;  %v411_v20 = vmul.f32 %v193_v7, %v71_v1 }
  0x15   :  { %v143_v21 = vrot.slane %v404_v12, 2  ;;  %v175_v22 = vrot.slane %v162_v13, 3  ;;  %v176_v23 = vrot.slane %v406_v14, 3  ;;  %v208_v24 = vrot.slane %v195_v15, 4 }
  0x16   :  { %v111_v27 = vsel %vm108_vm0, %v109_v17, %v110_v18  ;;  %v209_v28 = vrot.slane %v411_v20, 4  ;;  %v91_v36 = vmul.f32 %v89_v29, %v70_v25  ;;  %v97_v37 = vmul.f32 %v95_v30, %v70_v25 }
  0x17   :  { %v123_v31 = vadd.f32 %v111_v27, %v90_v8  ;;  %v144_v32 = vsel %vm141_vm1, %v142_v19, %v143_v21  ;;  %v177_v33 = vsel %vm174_vm2, %v175_v22, %v176_v23  ;;  %v99_v38 = vmul.f32 %v95_v30, %v72_v26 }
  0x18   :  { %v210_v35 = vsel %vm207_vm3, %v208_v24, %v209_v28  ;;  %v130_v40 = vmul.f32 %v128_v34, %v70_v25  ;;  %v132_v41 = vmul.f32 %v128_v34, %v72_v26  ;;  %v161_v42 = vperm.slane %v408_v16, 3 }
  0x19   :  { %v156_v39 = vadd.f32 %v144_v32, %v123_v31  ;;  %v112_v43 = vrot.slane %v97_v37, 1  ;;  %v113_v44 = vrot.slane %v99_v38, 1  ;;  %v194_v45 = vperm.slane %v408_v16, 4 }
  0x1a   :  { %v92_v46 = vmul.f32 %v88_v3, %v71_v1  ;;  %v145_v48 = vrot.slane %v130_v40, 2  ;;  %v146_v49 = vrot.slane %v132_v41, 2  ;;  %v163_v50 = vmul.f32 %v161_v42, %v70_v25 }
  0x1b   :  { %v189_v47 = vadd.f32 %v177_v33, %v156_v39  ;;  %v114_v51 = vsel %vm108_vm0, %v112_v43, %v113_v44  ;;  %v165_v52 = vmul.f32 %v161_v42, %v72_v26  ;;  %v196_v53 = vmul.f32 %v194_v45, %v70_v25 }
  0x1c   :  { %v198_v54 = vmul.f32 %v194_v45, %v72_v26  ;;  %v124_v56 = vadd.f32 %v114_v51, %v91_v36  ;;  %v147_v57 = vsel %vm141_vm1, %v145_v48, %v146_v49  ;;  %v178_v58 = vrot.slane %v163_v50, 3 }
  0x1d   :  { %v222_v55 = vadd.f32 %v210_v35, %v189_v47  ;;  %v179_v59 = vrot.slane %v165_v52, 3  ;;  %v211_v60 = vrot.slane %v196_v53, 4  ;;  %v100_v62 = vmul.f32 0.0, %v94_v4 }
  0x1e   :  { %v212_v61 = vrot.slane %v198_v54, 4  ;;  %v157_v63 = vadd.f32 %v147_v57, %v124_v56  ;;  %v133_v0 = vmul.f32 0.0, %v398_v5  ;;  %v166_v1 = vmul.f32 0.0, %v160_v6 }
  0x1f   :  { %226 = vst [vmem:[#allocation8] sm:$0xff] %v222_v55  ;;  %v199_v2 = vmul.f32 0.0, %v193_v7  ;;  %v180_v3 = vsel %vm174_vm2, %v178_v58, %v179_v59  ;;  %v115_v9 = vrot.slane %v100_v62, 1  ;;  %v101_v15 = vmul.f32 0.0, %v95_v30 }
  0x20   :  { %v213_v8 = vsel %vm207_vm3, %v211_v60, %v212_v61  ;;  %v190_v10 = vadd.f32 %v180_v3, %v157_v63  ;;  %v148_v11 = vrot.slane %v133_v0, 2  ;;  %v181_v12 = vrot.slane %v166_v1, 3 }
  0x21   :  { %v214_v13 = vrot.slane %v199_v2, 4  ;;  %v116_v14 = vsel %vm108_vm0, %v110_v18, %v115_v9  ;;  %v134_v16 = vmul.f32 0.0, %v128_v34  ;;  %v167_v4 = vmul.f32 0.0, %v161_v42 }
  0x22   :  { %v223_v17 = vadd.f32 %v213_v8, %v190_v10  ;;  %v125_v19 = vadd.f32 %v116_v14, %v92_v46  ;;  %v149_v5 = vsel %vm141_vm1, %v143_v21, %v148_v11  ;;  %v93_v6 = vmul.f32 %v89_v29, %v72_v26 }
  0x23   :  { %v182_v7 = vsel %vm174_vm2, %v176_v23, %v181_v12  ;;  %v117_v22 = vrot.slane %v101_v15, 1  ;;  %v150_v24 = vrot.slane %v134_v16, 2  ;;  %v183_v25 = vrot.slane %v167_v4, 3 }
  0x24   :  { %227 = vst [vmem:[#allocation8 + $0x8] sm:$0xff] %v223_v17  ;;  %v158_v27 = vadd.f32 %v149_v5, %v125_v19  ;;  %v200_v31 = vmul.f32 0.0, %v194_v45  ;;  %v215_v18 = vsel %vm207_vm3, %v209_v28, %v214_v13 }
  0x25   :  { %v118_v30 = vsel %vm108_vm0, %v113_v44, %v117_v22  ;;  %v151_v32 = vsel %vm141_vm1, %v146_v49, %v150_v24  ;;  %v184_v26 = vsel %vm174_vm2, %v179_v59, %v183_v25 }
  0x26   :  { %v191_v33 = vadd.f32 %v182_v7, %v158_v27  ;;  %v126_v34 = vadd.f32 %v118_v30, %v93_v6  ;;  %v216_v21 = vrot.slane %v200_v31, 4 }
  0x28   :  { %v224_v23 = vadd.f32 %v215_v18, %v191_v33  ;;  %v159_v29 = vadd.f32 %v151_v32, %v126_v34  ;;  %v217_v35 = vsel %vm207_vm3, %v212_v61, %v216_v21 }
  0x2a   :  { %228 = vst [vmem:[#allocation8 + $0x10] sm:$0xff] %v224_v23  ;;  %v192_v20 = vadd.f32 %v184_v26, %v159_v29 }
  0x2c   :  { %v225_v28 = vadd.f32 %v217_v35, %v192_v20 }
  0x2e   :  { %229 = vst [vmem:[#allocation8 + $0x18] sm:$0xff] %v225_v28 }
  0x2f   :  { %242 = dma.vmem_to_hbm [thread:$0]  %s235_s2, 512, %s237_s4, [#allocation4], %s362_s1, %s362_s1, %s363_s26  }
  0x30   :  { %358 = dma.done.wait [#allocation4], 512  }
  0x31   :  { %359 = vsyncadd [#allocation4], 4294966784 }
  0x32   :  { %247 = vsyncpa [#allocation3], 1 }
  0x33   :  { %248 = vsyncpa [#allocation6], 1 }
  0x34   :  { %249 = vsyncpa [#allocation4], 1 }

</bundles_post_ra>
